<compile_context>
chip_gen: v5e
topology: v5e:2x2
jax: 0.10.0
libtpu: 0.0.40
codegen_flags: <defaults>
</compile_context>

<pallas_src>
import math
import functools

import jax
import jax.numpy as jnp
from jax.experimental import pallas as pl
from jax.experimental.pallas import tpu as pltpu


def _round_up(x, m):
    return ((x + m - 1) // m) * m


def _embed_gather_kernel(ids_ref, emb_hbm, out_ref, row_buf, sems, *, tb, scale):
    """One grid step gathers `tb` embedding rows from HBM and stores a scaled tile.

    ids_ref : SMEM scalar-prefetch ref, shape (N_pad,), int32 token ids
    emb_hbm : HBM ref, full embedding table (voc_len, c_model)
    out_ref : VMEM ref, output tile (tb, c_model)
    row_buf : VMEM scratch, (tb, c_model) gather destination
    sems    : DMA semaphore array, shape (tb,)
    """
    i = pl.program_id(0)
    base = i * tb

    # Issue all `tb` row DMAs for this tile; they stay in flight concurrently,
    # turning the latency-bound single-row gather into a bandwidth-bound stream.
    @pl.loop(0, tb)
    def _(t):
        tok = ids_ref[base + t]
        pltpu.make_async_copy(
            emb_hbm.at[pl.ds(tok, 1)],       # (1, c_model) row in HBM
            row_buf.at[pl.ds(t, 1)],         # (1, c_model) slot in VMEM tile
            sems.at[t],
        ).start()

    # Wait for every row DMA (descriptor only needs matching shapes + sem).
    @pl.loop(0, tb)
    def _(t):
        pltpu.make_async_copy(
            emb_hbm.at[pl.ds(0, 1)],
            row_buf.at[pl.ds(t, 1)],
            sems.at[t],
        ).wait()

    # One dense, whole-tile scaled store (uses all 8 sublanes per vreg;
    # avoids per-row masked partial stores).
    out_ref[...] = (row_buf[...] * scale).astype(out_ref.dtype)


def target_embedding(tag, emb_weight, *, tb=128):
    """tag: int [B, S]; emb_weight: [voc_len, c_model].

    Returns [B, S, c_model] = emb_weight[tag] / sqrt(c_model).
    """
    B, S = tag.shape
    voc_len, c_model = emb_weight.shape
    N = B * S

    # Clamp ids so a bad id cannot trigger an out-of-bounds HBM DMA.
    ids = jnp.clip(tag.reshape(N).astype(jnp.int32), 0, voc_len - 1)

    # Tile size: multiple of 8 (sublane-aligned output block), no larger than
    # the (8-aligned) token count; pad the token stream to a multiple of it.
    tb = max(8, (int(tb) // 8) * 8)
    tb = min(tb, _round_up(N, 8))
    n_pad = _round_up(N, tb)
    if n_pad != N:
        ids = jnp.concatenate([ids, jnp.zeros((n_pad - N,), jnp.int32)])

    scale = 1.0 / math.sqrt(c_model)
    kernel = functools.partial(_embed_gather_kernel, tb=tb, scale=scale)

    out = pl.pallas_call(
        kernel,
        out_shape=jax.ShapeDtypeStruct((n_pad, c_model), emb_weight.dtype),
        grid_spec=pltpu.PrefetchScalarGridSpec(
            num_scalar_prefetch=1,            # ids land in SMEM
            grid=(n_pad // tb,),
            in_specs=[
                # Table stays in HBM; rows are gathered with manual DMAs.
                pl.BlockSpec(memory_space=pl.ANY),
            ],
            out_specs=pl.BlockSpec((tb, c_model), lambda i, ids: (i, 0)),
            scratch_shapes=[
                pltpu.VMEM((tb, c_model), emb_weight.dtype),
                pltpu.SemaphoreType.DMA((tb,)),
            ],
        ),
        compiler_params=pltpu.CompilerParams(
            # Each token tile is independent -> shard across TCs on v7x.
            dimension_semantics=("parallel",),
        ),
    )(ids, emb_weight)

    return out[:N].reshape(B, S, c_model)


if __name__ == "__main__":
    key = jax.random.PRNGKey(0)
    k_emb, k_tag = jax.random.split(key)

    # Module hyper-params (small, synthetic).
    voc_len = 32
    c_model = 32
    B, S = 2, 8

    # Deterministic parameter init (nn.Embedding default is N(0, 1)).
    emb_weight = jax.random.normal(k_emb, (voc_len, c_model), dtype=jnp.float32)

    # Deterministic example token ids.
    tag = jax.random.randint(k_tag, (B, S), 0, voc_len, dtype=jnp.int32)

    out = target_embedding(tag, emb_weight)
    out = jax.block_until_ready(out)

    # Reference check in plain JAX.
    ref = emb_weight[tag] / math.sqrt(c_model)
    assert out.shape == (B, S, c_model)
    assert jnp.allclose(out, ref, atol=1e-6), "mismatch vs reference"

    print("KERNEL_OK")
</pallas_src>

<mosaic_0001>
module attributes {stable_mosaic.version = 11 : i64} {
  func.func @_embed_gather_kernel(%arg0: i32, %arg1: memref<16xi32, #tpu.memory_space<smem>>, %arg2: memref<32x32xf32, #tpu.memory_space<any>>, %arg3: memref<16x32xf32, #tpu.memory_space<vmem>>, %arg4: memref<16x32xf32, #tpu.memory_space<vmem>>, %arg5: memref<16x!tpu.dma_semaphore, #tpu.memory_space<semaphore_mem>>) attributes {dimension_semantics = [#tpu.dimension_semantics<parallel>], iteration_bounds = array<i64: 1>, scalar_prefetch = 1 : i64, scratch_operands = 2 : i64, tpu.core_type = #tpu.core_type<tc>, window_params = [{}, {transform_indices = @transform_1, window_bounds = array<i64: 16, 32>}]} {
    %c16_i32 = arith.constant 16 : i32
    %0 = arith.muli %arg0, %c16_i32 : i32
    %c0_i32 = arith.constant 0 : i32
    %c16_i32_0 = arith.constant 16 : i32
    %1 = arith.addi %c0_i32, %c16_i32_0 : i32
    %c1_i32 = arith.constant 1 : i32
    scf.for %arg6 = %c0_i32 to %1 step %c1_i32  : i32 {
      %c1_i32_9 = arith.constant 1 : i32
      %7 = arith.muli %arg6, %c1_i32_9 : i32
      %c0_i32_10 = arith.constant 0 : i32
      %8 = arith.addi %c0_i32_10, %7 : i32
      %9 = arith.addi %0, %8 : i32
      %10 = arith.index_cast %9 : i32 to index
      %11 = memref.load %arg1[%10] : memref<16xi32, #tpu.memory_space<smem>>
      %c0_i32_11 = arith.constant 0 : i32
      %12 = tpu.memref_slice %arg2[%11, %c0_i32_11] : memref<32x32xf32, #tpu.memory_space<any>> -> memref<1x32xf32, #tpu.memory_space<any>>
      %c0_i32_12 = arith.constant 0 : i32
      %13 = tpu.memref_slice %arg4[%8, %c0_i32_12] : memref<16x32xf32, #tpu.memory_space<vmem>> -> memref<1x32xf32, #tpu.memory_space<vmem>>
      %14 = tpu.memref_slice %arg5[%8] : memref<16x!tpu.dma_semaphore, #tpu.memory_space<semaphore_mem>> -> memref<1x!tpu.dma_semaphore, #tpu.memory_space<semaphore_mem>>
      %15 = tpu.memref_squeeze %14 : memref<1x!tpu.dma_semaphore, #tpu.memory_space<semaphore_mem>> -> memref<!tpu.dma_semaphore, #tpu.memory_space<semaphore_mem>>
      tpu.enqueue_dma source(%12 : memref<1x32xf32, #tpu.memory_space<any>>) target(%13 : memref<1x32xf32, #tpu.memory_space<vmem>>) target_semaphore(%15 : memref<!tpu.dma_semaphore, #tpu.memory_space<semaphore_mem>>)
    }
    %c16_i32_1 = arith.constant 16 : i32
    %c0_i32_2 = arith.constant 0 : i32
    %c16_i32_3 = arith.constant 16 : i32
    %2 = arith.addi %c0_i32_2, %c16_i32_3 : i32
    %c1_i32_4 = arith.constant 1 : i32
    scf.for %arg6 = %c0_i32_2 to %2 step %c1_i32_4  : i32 {
      %c1_i32_9 = arith.constant 1 : i32
      %7 = arith.muli %arg6, %c1_i32_9 : i32
      %c0_i32_10 = arith.constant 0 : i32
      %8 = arith.addi %c0_i32_10, %7 : i32
      %c0_i32_11 = arith.constant 0 : i32
      %c0_i32_12 = arith.constant 0 : i32
      %9 = tpu.memref_slice %arg2[%c0_i32_11, %c0_i32_12] : memref<32x32xf32, #tpu.memory_space<any>> -> memref<1x32xf32, #tpu.memory_space<any>>
      %c0_i32_13 = arith.constant 0 : i32
      %10 = tpu.memref_slice %arg4[%8, %c0_i32_13] : memref<16x32xf32, #tpu.memory_space<vmem>> -> memref<1x32xf32, #tpu.memory_space<vmem>>
      %11 = tpu.memref_slice %arg5[%8] : memref<16x!tpu.dma_semaphore, #tpu.memory_space<semaphore_mem>> -> memref<1x!tpu.dma_semaphore, #tpu.memory_space<semaphore_mem>>
      %12 = tpu.memref_squeeze %11 : memref<1x!tpu.dma_semaphore, #tpu.memory_space<semaphore_mem>> -> memref<!tpu.dma_semaphore, #tpu.memory_space<semaphore_mem>>
      tpu.wait_dma2 semaphore(%12 : memref<!tpu.dma_semaphore, #tpu.memory_space<semaphore_mem>>) src(%9 : memref<1x32xf32, #tpu.memory_space<any>>) dst(%10 : memref<1x32xf32, #tpu.memory_space<vmem>>)
    }
    %c16_i32_5 = arith.constant 16 : i32
    %c0 = arith.constant 0 : index
    %c0_6 = arith.constant 0 : index
    %3 = vector.load %arg4[%c0, %c0_6] : memref<16x32xf32, #tpu.memory_space<vmem>>, vector<16x32xf32>
    %cst = arith.constant 0.176776692 : f32
    %4 = vector.broadcast %cst : f32 to vector<16x32xf32>
    %5 = arith.mulf %3, %4 : vector<16x32xf32>
    %c0_7 = arith.constant 0 : index
    %c0_8 = arith.constant 0 : index
    %6 = vector.load %arg3[%c0_7, %c0_8] : memref<16x32xf32, #tpu.memory_space<vmem>>, vector<16x32xf32>
    tpu.vector_store %arg3[%c0_7, %c0_8], %5 {strides = array<i32>} : memref<16x32xf32, #tpu.memory_space<vmem>>, vector<16x32xf32>,
    return
  }
  func.func @transform_1(%arg0: i32, %arg1: memref<16xi32, #tpu.memory_space<smem>>) -> (i32, i32) {
    %c0_i32 = arith.constant 0 : i32
    %c0_i32_0 = arith.constant 0 : i32
    return %arg0, %c0_i32 : i32, i32
  }
}

</mosaic_0001>

<bundles_post_ra>
// kernel: tpu_custom_call.1
= control target key start
LH: loop header
LB: loop body
LE: loop exit
PB: predicated region body
PF: predicated region fallthrough
CT: control target
= control target key end

     0   :  { %s319_s12 = smov [#allocation5]   ;;  %s368_s0 = inlined_call_operand.hbm [shape: s32[16], index: 0, kind: input, shape index: {}]   ;;  %s369_s1 = inlined_call_operand.hbm [shape: f32[32,32], index: 1, kind: input, shape index: {}]   ;;  %s370_s2 = inlined_call_operand.hbm [shape: f32[16,32], index: 2, kind: output, shape index: {}]  }
   0x1   :  { %s8_s11 = sshll.u32 %s368_s0, 4  ;;  %s9_s11 = int_to_ptr.hbm [resolvable:$true] %s8_s11 }
   0x2   :  { %11 = dma.hbm_to_smem %s9_s11, 16, %s319_s12, [#allocation4] }
   0x3   :  { %305 = dma.done.wait [#allocation4], 16 }
   0x4   :  { %306 = vsyncadd [#allocation4], 4294967280 }
   0x5   :  { %14 = sfence }
   0x6   :  { %15 = vsyncpa [#allocation7], 0  ;;  %s342_s13 = smov 0  }
   0x7 LB: > { %s24_s14 = sld [smem:[#allocation5 + %s313_s13]]  ;;  %s26_s15 = scalar_lea.vmem [#allocation2], %s313_s13  ;;  %s313_s13 = sphi %s342_s13, %s22_s13  }
   0x8   : > { %s349_s0 = sshll.u32 %s26_s15, 4  ;;  %s27_s20 = scalar_lea.sflag [#allocation3], %s313_s13  ;;  %s38_s0 = int_to_ptr.vmem [resolvable:$true] %s349_s0 }
   0x9   : > { %s253_s25 = scalar_lea.hbm %s369_s1, 32 }
   0xd   : > { %s25_s18 = scalar_lea.hbm %s369_s1, %s24_s14 }
   0xe   : > { %s35_s19 = sshll.u32 %s25_s18, 4  ;;  %s36_s19 = int_to_ptr.hbm [resolvable:$true] %s35_s19 }
   0xf   : > { %s249_s21 = sshra.s32 %s36_s19, 4  ;;  %s250_s21 = int_to_ptr.hbm [resolvable:$true] %s249_s21 }
  0x10   : > { %s251_s22 = scalar_lea.hbm %s250_s21, 1  ;;  %p254_p1 = scmp.lt.s32.totalorder %s250_s21, %s369_s1 }
  0x11   : > { %p252_p0 = scmp.ne.s32.totalorder %s250_s21, %s251_s22  ;;  %p255_p2 = scmp.lt.s32.totalorder %s253_s25, %s251_s22 }
  0x13   : > { %p256_p3 = por %p255_p2, %p254_p1 }
  0x15   : > { %p257_p4 = pnand %p256_p3, %p252_p0 }
  0x17   : > { %260 = shalt.err (!%p257_p4)  }
  0x18   : > { %s261_s28 = sshra.s32 %s38_s0, 4  ;;  %s320_s30 = smov [#allocation2]   ;;  %s262_s28 = int_to_ptr.vmem [resolvable:$true] %s261_s28 }
  0x19   : > { %s263_s29 = scalar_lea.vmem %s262_s28, 1  ;;  %s265_s3 = scalar_lea.vmem %s320_s30, 16 }
  0x1a   : > { %p264_p5 = scmp.ne.s32.totalorder %s262_s28, %s263_s29  ;;  %p266_p6 = scmp.lt.s32.totalorder %s262_s28, [#allocation2] }
  0x1b   : > { %p267_p7 = scmp.lt.s32.totalorder %s265_s3, %s263_s29 }
  0x1d   : > { %p268_p8 = por %p267_p7, %p266_p6 }
  0x1f   : > { %p269_p9 = pnand %p268_p8, %p264_p5 }
  0x21   : > { %272 = shalt.err (!%p269_p9)  }
  0x22   : > { %40 = dma.hbm_to_vmem [thread:$0]  %s36_s19, 16, %s38_s0, %s27_s20 }
  0x23   : > { %s22_s13 = sadd.s32 1, %s313_s13  }
  0x24   : > { %p19_p10 = scmp.ge.s32.totalorder %s22_s13, 16  }
  0x25   :  { %s315_s4 = smov (%p19_p10), 0  }
  0x26   :  { %21 = sbr.rel (!%p19_p10) target bundleno = 7 (0x7), region = 57 }
  0x2b LB: > { %s47_s5 = scalar_lea.sflag [#allocation3], %s317_s4  ;;  %s317_s4 = sphi %s315_s4, %s46_s4  }
  0x2c   : > { %307 = dma.done.wait %s47_s5, 16 }
  0x2d   : > { %308 = vsyncadd %s47_s5, 4294967280  ;;  %s46_s4 = sadd.s32 1, %s317_s4  }
  0x2e   : > { %p43_p11 = scmp.ge.s32.totalorder %s46_s4, 16  }
  0x2f   :  { %v51_v0 = vld [vmem:[#allocation2] sm:$0xff] (%p43_p11)  ;;  %vm55_vm0 = vcmask (%p43_p11), 261120   ;;  %v52_v1 = vld [vmem:[#allocation2 + $0x8] sm:$0xff] (%p43_p11)  ;;  %s64_s8 = sshll.u32 (%p43_p11), %s370_s2, 4  ;;  %s321_s1 = smov (%p43_p11), [#allocation6]   ;;  %s65_s8 = int_to_ptr.hbm [resolvable:$true] %s64_s8 }
  0x30   :  { %45 = sbr.rel (!%p43_p11) target bundleno = 43 (0x2b), region = 68  ;;  %v53_v2 = vmul.f32 (%p43_p11), 0.17677669, %v51_v0  ;;  %v54_v3 = vmul.f32 (%p43_p11), 0.17677669, %v52_v1  ;;  %s62_s9 = sshll.u32 (%p43_p11), %s321_s1, 4  ;;  %s63_s9 = int_to_ptr.vmem [resolvable:$true] %s62_s9 }
  0x31   :  { %s322_s10 = smov (%p43_p11), 128   ;;  %s323_s11 = smov (%p43_p11), 8  }
  0x32   :  { %56 = vst.msk [vmem:[#allocation6] sm:$0xff] (%p43_p11), %vm55_vm0, %v53_v2 }
  0x33   :  { %57 = vst.msk [vmem:[#allocation6 + $0x8] sm:$0xff] (%p43_p11), %vm55_vm0, %v54_v3 }
  0x34   :  { %70 = dma.vmem_to_hbm [thread:$0]  (%p43_p11), %s63_s9, 256, %s65_s8, [#allocation7], %s322_s10, %s322_s10, %s323_s11  }
  0x35   :  { %309 = dma.done.wait [#allocation7], 256  }
  0x36   :  { %310 = vsyncadd [#allocation7], 4294967040 }
  0x37   :  { %75 = vsyncpa [#allocation7], 1 }
  0x38   :  { %76 = vsyncmov [#allocation3] }
  0x3b   :  { %s77_s12 = vpop.sfrf %76 }
  0x3c   :  { %p201_p12 = scmp.ne.s32.totalorder %s77_s12, 0 }
  0x3e   :  { %81 = shalt.err (%p201_p12)  }
  0x3f   :  { %83 = vsyncmov [#allocation3 + $0x1] }
  0x42   :  { %s84_s2 = vpop.sfrf %83 }
  0x43   :  { %p202_p13 = scmp.ne.s32.totalorder %s84_s2, 0 }
  0x45   :  { %88 = shalt.err (%p202_p13)  }
  0x46   :  { %90 = vsyncmov [#allocation3 + $0x2] }
  0x49   :  { %s91_s13 = vpop.sfrf %90 }
  0x4a   :  { %p203_p0 = scmp.ne.s32.totalorder %s91_s13, 0 }
  0x4c   :  { %95 = shalt.err (%p203_p0)  }
  0x4d   :  { %97 = vsyncmov [#allocation3 + $0x3] }
  0x50   :  { %s98_s14 = vpop.sfrf %97 }
  0x51   :  { %p204_p1 = scmp.ne.s32.totalorder %s98_s14, 0 }
  0x53   :  { %102 = shalt.err (%p204_p1)  }
  0x54   :  { %104 = vsyncmov [#allocation3 + $0x4] }
  0x57   :  { %s105_s15 = vpop.sfrf %104 }
  0x58   :  { %p205_p2 = scmp.ne.s32.totalorder %s105_s15, 0 }
  0x5a   :  { %109 = shalt.err (%p205_p2)  }
  0x5b   :  { %111 = vsyncmov [#allocation3 + $0x5] }
  0x5e   :  { %s112_s0 = vpop.sfrf %111 }
  0x5f   :  { %p206_p3 = scmp.ne.s32.totalorder %s112_s0, 0 }
  0x61   :  { %116 = shalt.err (%p206_p3)  }
  0x62   :  { %118 = vsyncmov [#allocation3 + $0x6] }
  0x65   :  { %s119_s16 = vpop.sfrf %118 }
  0x66   :  { %p207_p4 = scmp.ne.s32.totalorder %s119_s16, 0 }
  0x68   :  { %123 = shalt.err (%p207_p4)  }
  0x69   :  { %125 = vsyncmov [#allocation3 + $0x7] }
  0x6c   :  { %s126_s17 = vpop.sfrf %125 }
  0x6d   :  { %p208_p5 = scmp.ne.s32.totalorder %s126_s17, 0 }
  0x6f   :  { %130 = shalt.err (%p208_p5)  }
  0x70   :  { %132 = vsyncmov [#allocation3 + $0x8] }
  0x73   :  { %s133_s18 = vpop.sfrf %132 }
  0x74   :  { %p209_p6 = scmp.ne.s32.totalorder %s133_s18, 0 }
  0x76   :  { %137 = shalt.err (%p209_p6)  }
  0x77   :  { %139 = vsyncmov [#allocation3 + $0x9] }
  0x7a   :  { %s140_s19 = vpop.sfrf %139 }
  0x7b   :  { %p210_p7 = scmp.ne.s32.totalorder %s140_s19, 0 }
  0x7d   :  { %144 = shalt.err (%p210_p7)  }
  0x7e   :  { %146 = vsyncmov [#allocation3 + $0xa] }
  0x81   :  { %s147_s20 = vpop.sfrf %146 }
  0x82   :  { %p211_p8 = scmp.ne.s32.totalorder %s147_s20, 0 }
  0x84   :  { %151 = shalt.err (%p211_p8)  }
  0x85   :  { %153 = vsyncmov [#allocation3 + $0xb] }
  0x88   :  { %s154_s21 = vpop.sfrf %153 }
  0x89   :  { %p212_p9 = scmp.ne.s32.totalorder %s154_s21, 0 }
  0x8b   :  { %158 = shalt.err (%p212_p9)  }
  0x8c   :  { %160 = vsyncmov [#allocation3 + $0xc] }
  0x8f   :  { %s161_s22 = vpop.sfrf %160 }
  0x90   :  { %p213_p10 = scmp.ne.s32.totalorder %s161_s22, 0 }
  0x92   :  { %165 = shalt.err (%p213_p10)  }
  0x93   :  { %167 = vsyncmov [#allocation3 + $0xd] }
  0x96   :  { %s168_s23 = vpop.sfrf %167 }
  0x97   :  { %p214_p11 = scmp.ne.s32.totalorder %s168_s23, 0 }
  0x99   :  { %172 = shalt.err (%p214_p11)  }
  0x9a   :  { %174 = vsyncmov [#allocation3 + $0xe] }
  0x9d   :  { %s175_s24 = vpop.sfrf %174 }
  0x9e   :  { %p215_p12 = scmp.ne.s32.totalorder %s175_s24, 0 }
  0xa0   :  { %179 = shalt.err (%p215_p12)  }
  0xa1   :  { %181 = vsyncmov [#allocation3 + $0xf] }
  0xa4   :  { %s182_s25 = vpop.sfrf %181 }
  0xa5   :  { %p216_p13 = scmp.ne.s32.totalorder %s182_s25, 0 }
  0xa7   :  { %186 = shalt.err (%p216_p13)  }

</bundles_post_ra>
